<compile_context>
chip_gen: v5e
topology: v5e:2x2
jax: 0.10.0
libtpu: 0.0.40
codegen_flags: <defaults>
</compile_context>

<pallas_src>
import jax
import jax.numpy as jnp
from jax.experimental import pallas as pl
from jax.experimental.pallas import tpu as pltpu

_LANE_CHOICES = (2048, 1024, 512, 256, 128)  # lane-dense widths (multiples of 128)
_FALLBACK_LANES = 512                        # used only when total % 128 != 0
_TARGET_TILE_BYTES = 1 << 20                 # ~1 MiB per f32 block


def _siren_filter_kernel(z_ref, u_ref, o_ref):
    # Elementwise hot path on the VMEM tile: VPU add + EUP sin.
    x = z_ref[...].astype(jnp.float32) + u_ref[...].astype(jnp.float32)
    o_ref[...] = jnp.sin(x).astype(o_ref.dtype)


def _pick_lanes(total):
    for lanes in _LANE_CHOICES:
        if total % lanes == 0:
            return lanes
    return _FALLBACK_LANES


def siren_filter(z, u):
    """Pallas implementation of SIRENFilter.forward(z, u) = sin(z + u).

    z, u: arrays of identical shape/dtype. Returns sin(z + u), same shape/dtype.
    """
    assert z.shape == u.shape, "module adds tensors of identical shape"
    assert z.dtype == u.dtype
    orig_shape = z.shape
    dtype = z.dtype

    total = 1
    for d in orig_shape:
        total *= d

    # Lane-dense 2D view (rows, lanes).  Pad only when no lane width divides
    # the element count (i.e. total % 128 != 0).
    lanes = _pick_lanes(total)
    rows = pl.cdiv(total, lanes)
    padded_total = rows * lanes

    zf = z.reshape(-1)
    uf = u.reshape(-1)
    if padded_total != total:
        pad = padded_total - total
        zf = jnp.pad(zf, (0, pad))
        uf = jnp.pad(uf, (0, pad))
    z2 = zf.reshape(rows, lanes)
    u2 = uf.reshape(rows, lanes)

    # ~1 MiB f32 blocks; multiple of 8 rows, or the full row extent if smaller.
    target_rows = max(8, _TARGET_TILE_BYTES // (lanes * 4))
    tile_rows = rows if rows <= target_rows else target_rows
    grid = (pl.cdiv(rows, tile_rows),)  # last block may overhang; Pallas masks it

    spec = pl.BlockSpec((tile_rows, lanes), lambda i: (i, 0))
    itemsize = jnp.dtype(dtype).itemsize
    cost = pl.CostEstimate(
        flops=padded_total,                        # one add per element
        transcendentals=padded_total,              # one sin per element
        bytes_accessed=3 * padded_total * itemsize,
    )

    out2 = pl.pallas_call(
        _siren_filter_kernel,
        out_shape=jax.ShapeDtypeStruct((rows, lanes), dtype),
        grid_spec=pltpu.PrefetchScalarGridSpec(
            num_scalar_prefetch=0,
            grid=grid,
            in_specs=[spec, spec],
            out_specs=spec,
        ),
        compiler_params=pltpu.CompilerParams(
            dimension_semantics=("parallel",),     # embarrassingly parallel tiles
        ),
        cost_estimate=cost,
    )(z2, u2)

    out = out2.reshape(-1)
    if padded_total != total:
        out = out[:total]
    return out.reshape(orig_shape)


if __name__ == "__main__":
    # Small NCHW shapes consistent with an INR feature map.
    B, C, H, W = 2, 4, 16, 16
    key = jax.random.PRNGKey(0)
    kz, ku = jax.random.split(key)
    z = jax.random.normal(kz, (B, C, H, W), dtype=jnp.float32)
    u = jax.random.normal(ku, (B, C, H, W), dtype=jnp.float32)

    out = jax.block_until_ready(siren_filter(z, u))
    ref = jnp.sin(z + u)
    assert out.shape == (B, C, H, W)
    assert out.dtype == z.dtype
    assert jnp.allclose(out, ref, atol=1e-5, rtol=1e-5)

    # Padded-tail fallback path (element count not a multiple of 128).
    z_odd = jax.random.normal(kz, (3, 8, 37, 41), dtype=jnp.float32)
    u_odd = jax.random.normal(ku, (3, 8, 37, 41), dtype=jnp.float32)
    out_odd = jax.block_until_ready(siren_filter(z_odd, u_odd))
    assert jnp.allclose(out_odd, jnp.sin(z_odd + u_odd), atol=1e-5, rtol=1e-5)

    # Multi-tile path with a ragged last grid block (no host-side padding).
    z_big = jax.random.normal(kz, (5, 8, 64, 128), dtype=jnp.float32)
    u_big = jax.random.normal(ku, (5, 8, 64, 128), dtype=jnp.float32)
    out_big = jax.block_until_ready(siren_filter(z_big, u_big))
    assert jnp.allclose(out_big, jnp.sin(z_big + u_big), atol=1e-5, rtol=1e-5)

    print("KERNEL_OK")
</pallas_src>

<mosaic_0001>
module attributes {stable_mosaic.version = 11 : i64} {
  func.func @_siren_filter_kernel(%arg0: i32, %arg1: memref<1x2048xf32, #tpu.memory_space<vmem>>, %arg2: memref<1x2048xf32, #tpu.memory_space<vmem>>, %arg3: memref<1x2048xf32, #tpu.memory_space<vmem>>) attributes {dimension_semantics = [#tpu.dimension_semantics<parallel>], iteration_bounds = array<i64: 1>, scalar_prefetch = 0 : i64, scratch_operands = 0 : i64, tpu.core_type = #tpu.core_type<tc>, window_params = [{transform_indices = @transform_0, window_bounds = array<i64: 1, 2048>}, {transform_indices = @transform_1, window_bounds = array<i64: 1, 2048>}, {transform_indices = @transform_2, window_bounds = array<i64: 1, 2048>}]} {
    %c0 = arith.constant 0 : index
    %c0_0 = arith.constant 0 : index
    %0 = vector.load %arg1[%c0, %c0_0] : memref<1x2048xf32, #tpu.memory_space<vmem>>, vector<1x2048xf32>
    %c0_1 = arith.constant 0 : index
    %c0_2 = arith.constant 0 : index
    %1 = vector.load %arg2[%c0_1, %c0_2] : memref<1x2048xf32, #tpu.memory_space<vmem>>, vector<1x2048xf32>
    %2 = arith.addf %0, %1 : vector<1x2048xf32>
    %3 = math.sin %2 : vector<1x2048xf32>
    %c0_3 = arith.constant 0 : index
    %c0_4 = arith.constant 0 : index
    %4 = vector.load %arg3[%c0_3, %c0_4] : memref<1x2048xf32, #tpu.memory_space<vmem>>, vector<1x2048xf32>
    tpu.vector_store %arg3[%c0_3, %c0_4], %3 {strides = array<i32>} : memref<1x2048xf32, #tpu.memory_space<vmem>>, vector<1x2048xf32>,
    return
  }
  func.func @transform_0(%arg0: i32) -> (i32, i32) {
    %c0_i32 = arith.constant 0 : i32
    %c0_i32_0 = arith.constant 0 : i32
    return %arg0, %c0_i32 : i32, i32
  }
  func.func @transform_1(%arg0: i32) -> (i32, i32) {
    %c0_i32 = arith.constant 0 : i32
    %c0_i32_0 = arith.constant 0 : i32
    return %arg0, %c0_i32 : i32, i32
  }
  func.func @transform_2(%arg0: i32) -> (i32, i32) {
    %c0_i32 = arith.constant 0 : i32
    %c0_i32_0 = arith.constant 0 : i32
    return %arg0, %c0_i32 : i32, i32
  }
}

</mosaic_0001>

<bundles_post_ra>
// kernel: tpu_custom_call.1
= control target key start
LH: loop header
LB: loop body
LE: loop exit
PB: predicated region body
PF: predicated region fallthrough
CT: control target
= control target key end

     0   :  { %7 = vsyncpa [#allocation3], 0  ;;  %s677_s0 = inlined_call_operand.hbm [shape: f32[1,2048], index: 0, kind: input, shape index: {}]   ;;  %s678_s1 = inlined_call_operand.hbm [shape: f32[1,2048], index: 1, kind: input, shape index: {}]   ;;  %s679_s2 = inlined_call_operand.hbm [shape: f32[1,2048], index: 2, kind: output, shape index: {}]  }
   0x1   :  { %8 = vsyncpa [#allocation6], 0 }
   0x2   :  { %9 = vsyncpa [#allocation4], 0  ;;  %s15_s11 = sshll.u32 %s677_s0, 4  ;;  %s470_s12 = smov [#allocation2]   ;;  %s16_s11 = int_to_ptr.hbm [resolvable:$true] %s15_s11 }
   0x3   :  { %s17_s13 = sshll.u32 %s470_s12, 4  ;;  %s26_s16 = sshll.u32 %s678_s1, 4  ;;  %s18_s13 = int_to_ptr.vmem [resolvable:$true] %s17_s13  ;;  %s27_s16 = int_to_ptr.hbm [resolvable:$true] %s26_s16 }
   0x4   :  { %20 = dma.hbm_to_vmem [thread:$0]  %s16_s11, 256, %s18_s13, [#allocation3]  }
   0x5   :  { %s471_s17 = smov [#allocation5]  }
   0x6   :  { %s28_s18 = sshll.u32 %s471_s17, 4  ;;  %s29_s18 = int_to_ptr.vmem [resolvable:$true] %s28_s18 }
   0x7   :  { %31 = dma.hbm_to_vmem [thread:$0]  %s27_s16, 256, %s29_s18, [#allocation6]  }
   0x8   :  { %464 = dma.done.wait [#allocation3], 256  }
   0x9   :  { %465 = vsyncadd [#allocation3], 4294967040 }
   0xa   :  { %466 = dma.done.wait [#allocation6], 256  }
   0xb   :  { %467 = vsyncadd [#allocation6], 4294967040  ;;  %v40_v0 = vld [vmem:[#allocation2] sm:$0xff]  ;;  %v41_v1 = vld [vmem:[#allocation2 + $0x8] sm:$0xff]  ;;  %v472_v27 = vmov 683565275  }
   0xc   :  { %v42_v2 = vld [vmem:[#allocation5] sm:$0xff]  ;;  %v43_v3 = vld [vmem:[#allocation5 + $0x8] sm:$0xff]  ;;  %v473_v29 = vmov 2475754826   ;;  %v474_v31 = vmov 2131351028  }
   0xd   :  { %v501_v4 = vadd.f32 %v42_v2, %v40_v0  ;;  %v503_v5 = vadd.f32 %v43_v3, %v41_v1  ;;  %v475_v33 = vmov 2102212464   ;;  %v476_v35 = vmov 920167782   ;;  %s479_s0 = smov [#allocation7]   ;;  %s365_s21 = sshll.u32 %s679_s2, 4  ;;  %s366_s21 = int_to_ptr.hbm [resolvable:$true] %s365_s21 }
   0xe   :  { %v477_v44 = vmov 1326507024   ;;  %s363_s1 = sshll.u32 %s479_s0, 4  ;;  %s364_s1 = int_to_ptr.vmem [resolvable:$true] %s363_s1 }
   0xf   :  { %v46_v6 = vand.u32 2147483647, %v501_v4  ;;  %v49_v7 = vand.u32 2139095040, %v501_v4  ;;  %v201_v8 = vand.u32 2147483647, %v503_v5  ;;  %v204_v9 = vand.u32 2139095040, %v503_v5 }
  0x11   :  { %v50_v10 = vshrl.u32 %v49_v7, 23  ;;  %v53_v11 = vand.u32 8388607, %v46_v6  ;;  %v205_v12 = vshrl.u32 %v204_v9, 23  ;;  %v208_v16 = vand.u32 8388607, %v201_v8 }
  0x13   :  { %v376_v13 = vadd.s32 4294967169, %v50_v10  ;;  %v54_v14 = vor.u32 8388608, %v53_v11  ;;  %v379_v15 = vadd.s32 4294967169, %v205_v12  ;;  %v209_v21 = vor.u32 8388608, %v208_v16 }
  0x15   :  { %v56_v17 = vadd.s32 1, %v376_v13  ;;  %v211_v18 = vadd.s32 1, %v379_v15  ;;  %v513_v20 = vshll.u32 %v54_v14, 8  ;;  %v523_v38 = vshll.u32 %v209_v21, 8 }
  0x17   :  { %vm57_vm0 = vcmp.gt.s32.totalorder %v56_v17, 0  ;;  %vm212_vm1 = vcmp.gt.s32.totalorder %v211_v18, 0  ;;  %v95_v37 = vand.u32 65535, %v513_v20  ;;  %v96_v42 = vshrl.u32 %v513_v20, 16 }
  0x18   :  { %v58_v19 = vsel %vm57_vm0, %v56_v17, 0  ;;  %v213_v23 = vsel %vm212_vm1, %v211_v18, 0 }
  0x19   :  { %v60_v22 = vand.u32 31, %v58_v19  ;;  %v515_v24 = vshrl.u32 %v58_v19, 5  ;;  %v517_v25 = vand.u32 31, %v213_v23  ;;  %v541_v55 = vshrl.u32 %v213_v23, 5 }
  0x1b   :  { %v61_v26 = vsub.s32 32, %v60_v22  ;;  %v63_v28 = vshll.u32 %v472_v27, %v60_v22  ;;  %v66_v30 = vshll.u32 %v473_v29, %v60_v22  ;;  %v69_v32 = vshll.u32 %v474_v31, %v60_v22 }
  0x1c   :  { %v72_v34 = vshll.u32 %v475_v33, %v60_v22  ;;  %v75_v36 = vshll.u32 %v476_v35, %v60_v22  ;;  %vm78_vm2 = vcmp.lt.s32.totalorder %v515_v24, 1  ;;  %vm81_vm3 = vcmp.lt.s32.totalorder %v515_v24, 4 }
  0x1d   :  { %v64_v39 = vshrl.u32 %v473_v29, %v61_v26  ;;  %v67_v40 = vshrl.u32 %v474_v31, %v61_v26  ;;  %v70_v41 = vshrl.u32 %v475_v33, %v61_v26  ;;  %v73_v43 = vshrl.u32 %v476_v35, %v61_v26 }
  0x1e   :  { %v76_v45 = vshrl.u32 %v477_v44, %v61_v26  ;;  %v532_v49 = vsub.s32 32, %v517_v25  ;;  %v62_v50 = vshrl.u32 %v472_v27, %v61_v26  ;;  %vm80_vm4 = vcmp.lt.s32.totalorder %v515_v24, 3 }
  0x1f   :  { %v65_v46 = vor.u32 %v64_v39, %v63_v28  ;;  %v68_v47 = vor.u32 %v67_v40, %v66_v30  ;;  %v71_v48 = vor.u32 %v70_v41, %v69_v32  ;;  %v74_v51 = vor.u32 %v73_v43, %v72_v34 }
  0x20   :  { %v77_v52 = vor.u32 %v76_v45, %v75_v36  ;;  %vm79_vm5 = vcmp.lt.s32.totalorder %v515_v24, 2  ;;  %v218_v58 = vshll.u32 %v472_v27, %v517_v25  ;;  %v221_v59 = vshll.u32 %v473_v29, %v517_v25 }
  0x21   :  { %v86_v53 = vsel %vm78_vm2, %v65_v46, %v68_v47  ;;  %v90_v54 = vsel %vm78_vm2, %v68_v47, %v71_v48  ;;  %v87_v56 = vsel %vm81_vm3, %v74_v51, 920167782  ;;  %v83_v60 = vsel %vm81_vm3, %v71_v48, 2102212464 }
  0x22   :  { %v91_v57 = vsel %vm81_vm3, %v77_v52, 1326507024  ;;  %v88_v61 = vsel %vm80_vm4, %v71_v48, %v87_v56  ;;  %v219_v63 = vshrl.u32 %v473_v29, %v532_v49  ;;  %v82_v0 = vsel %vm78_vm2, %v62_v50, %v65_v46 }
  0x23   :  { %v92_v62 = vsel %vm80_vm4, %v74_v51, %v91_v57  ;;  %v89_v1 = vsel %vm79_vm5, %v86_v53, %v88_v61  ;;  %v222_v3 = vshrl.u32 %v474_v31, %v532_v49  ;;  %v84_v12 = vsel %vm80_vm4, %v68_v47, %v83_v60 }
  0x24   :  { %v93_v2 = vsel %vm79_vm5, %v90_v54, %v92_v62  ;;  %v119_v10 = vand.u32 65535, %v89_v1  ;;  %v120_v11 = vshrl.u32 %v89_v1, 16  ;;  %v566_v13 = vor.u32 %v219_v63, %v218_v58 }
  0x25   :  { %v97_v7 = vand.u32 65535, %v93_v2  ;;  %v98_v9 = vshrl.u32 %v93_v2, 16  ;;  %v568_v14 = vor.u32 %v222_v3, %v221_v59  ;;  %v224_v15 = vshll.u32 %v474_v31, %v517_v25 }
  0x26   :  { %v225_v19 = vshrl.u32 %v475_v33, %v532_v49  ;;  %v121_v22 = vmul.u32 %v119_v10, %v95_v37  ;;  %v122_v23 = vmul.u32 %v120_v11, %v95_v37  ;;  %v123_v26 = vmul.u32 %v119_v10, %v96_v42 }
  0x27   :  { %v99_v16 = vmul.u32 %v97_v7, %v95_v37  ;;  %v100_v17 = vmul.u32 %v98_v9, %v95_v37  ;;  %v101_v18 = vmul.u32 %v97_v7, %v96_v42  ;;  %v102_v21 = vmul.u32 %v98_v9, %v96_v42 }
  0x28   :  { %v124_v32 = vmul.u32 %v120_v11, %v96_v42  ;;  %v125_v36 = vshll.u32 %v122_v23, 16  ;;  %v126_v39 = vshrl.u32 %v122_v23, 16  ;;  %v127_v40 = vshll.u32 %v123_v26, 16 }
  0x29   :  { %v103_v28 = vshll.u32 %v100_v17, 16  ;;  %v104_v29 = vshrl.u32 %v100_v17, 16  ;;  %v105_v30 = vshll.u32 %v101_v18, 16  ;;  %v106_v34 = vshrl.u32 %v101_v18, 16 }
  0x2a   :  { %v128_v41 = vshrl.u32 %v123_v26, 16  ;;  %v227_v43 = vshll.u32 %v475_v33, %v517_v25  ;;  %v478_v45 = vmov 0   ;;  %vm129_vm7 = vc.u32 %v121_v22, %v125_v36 }
  0x2b   :  { %vm107_vm6 = vc.u32 %v99_v16, %v103_v28  ;;  %v109_v31 = vadd.s32 %v103_v28, %v99_v16  ;;  %v131_v37 = vadd.s32 %v125_v36, %v121_v22  ;;  %v228_v47 = vshrl.u32 %v476_v35, %v532_v49 }
  0x2c   :  { %v108_v46 = vsel %vm107_vm6, 1, %v478_v45  ;;  %v130_v42 = vsel %vm129_vm7, 1, %v478_v45  ;;  %v230_v50 = vshll.u32 %v476_v35, %v517_v25  ;;  %v226_v33 = vor.u32 %v225_v19, %v224_v15 }
  0x2d   :  { %v110_v48 = vadd.s32 %v108_v46, %v102_v21  ;;  %vm111_vm8 = vc.u32 %v109_v31, %v105_v30  ;;  %v132_v52 = vadd.s32 %v130_v42, %v124_v32  ;;  %vm133_vm9 = vc.u32 %v131_v37, %v127_v40 }
  0x2e   :  { %v112_v51 = vsel %vm111_vm8, 1, %v478_v45  ;;  %v134_v54 = vsel %vm133_vm9, 1, %v478_v45  ;;  %v229_v56 = vor.u32 %v228_v47, %v227_v43  ;;  %v231_v57 = vshrl.u32 %v477_v44, %v532_v49 }
  0x2f   :  { %v114_v53 = vadd.s32 %v112_v51, %v110_v48  ;;  %v585_v58 = vadd.s32 %v131_v37, %v127_v40  ;;  %v136_v59 = vadd.s32 %v134_v54, %v132_v52  ;;  %vm233_vm10 = vcmp.lt.s32.totalorder %v541_v55, 1 }
  0x30   :  { %vm235_vm11 = vcmp.lt.s32.totalorder %v541_v55, 3  ;;  %v232_v35 = vor.u32 %v231_v57, %v230_v50  ;;  %vm234_vm12 = vcmp.lt.s32.totalorder %v541_v55, 2  ;;  %vm236_vm13 = vcmp.lt.s32.totalorder %v541_v55, 4 }
  0x31   :  { %v115_v25 = vadd.s32 %v114_v53, %v104_v29  ;;  %v85_v60 = vsel %vm79_vm5, %v82_v0, %v84_v12  ;;  %v137_v61 = vadd.s32 %v136_v59, %v126_v39  ;;  %v241_v44 = vsel %vm233_vm10, %v566_v13, %v568_v14 }
  0x32   :  { %v242_v62 = vsel %vm236_vm13, %v229_v56, 920167782  ;;  %v245_v2 = vsel %vm233_vm10, %v568_v14, %v226_v33  ;;  %v250_v24 = vand.u32 65535, %v523_v38  ;;  %v246_v7 = vsel %vm236_vm13, %v232_v35, 1326507024 }
  0x33   :  { %v599_v63 = vadd.s32 %v115_v25, %v106_v34  ;;  %v243_v1 = vsel %vm235_vm11, %v226_v33, %v242_v62  ;;  %v138_v0 = vadd.s32 %v137_v61, %v128_v41  ;;  %v251_v9 = vshrl.u32 %v523_v38, 16 }
  0x34   :  { %v244_v3 = vsel %vm234_vm12, %v241_v44, %v243_v1  ;;  %v139_v10 = vmul.u32 %v513_v20, %v85_v60  ;;  %v247_v11 = vsel %vm235_vm11, %v229_v56, %v246_v7  ;;  %v217_v22 = vshrl.u32 %v472_v27, %v532_v49 }
  0x35   :  { %vm141_vm14 = vc.u32 %v599_v63, %v585_v58  ;;  %v274_v12 = vand.u32 65535, %v244_v3  ;;  %v142_v15 = vadd.s32 1, %v138_v0  ;;  %v248_v16 = vsel %vm234_vm12, %v245_v2, %v247_v11 }
  0x36   :  { %v275_v17 = vshrl.u32 %v244_v3, 16  ;;  %v252_v18 = vand.u32 65535, %v248_v16  ;;  %v253_v19 = vshrl.u32 %v248_v16, 16  ;;  %v238_v39 = vsel %vm236_vm13, %v226_v33, 2102212464 }
  0x37   :  { %v143_v21 = vsel %vm141_vm14, %v142_v15, %v138_v0  ;;  %v278_v20 = vmul.u32 %v274_v12, %v251_v9  ;;  %v276_v30 = vmul.u32 %v274_v12, %v250_v24  ;;  %v237_v41 = vsel %vm233_vm10, %v217_v22, %v566_v13 }
  0x38   :  { %v277_v23 = vmul.u32 %v275_v17, %v250_v24  ;;  %v144_v26 = vadd.s32 %v143_v21, %v139_v10  ;;  %v254_v28 = vmul.u32 %v252_v18, %v250_v24  ;;  %v255_v29 = vmul.u32 %v253_v19, %v250_v24 }
  0x39   :  { %v256_v32 = vmul.u32 %v252_v18, %v251_v9  ;;  %v257_v40 = vmul.u32 %v253_v19, %v251_v9  ;;  %v279_v27 = vmul.u32 %v275_v17, %v251_v9  ;;  %v282_v49 = vshll.u32 %v278_v20, 16 }
  0x3a   :  { %v280_v34 = vshll.u32 %v277_v23, 16  ;;  %v145_v36 = vadd.s32 536870912, %v144_v26  ;;  %v258_v31 = vshll.u32 %v255_v29, 16  ;;  %v239_v47 = vsel %vm235_vm11, %v568_v14, %v238_v39 }
  0x3b   :  { %v260_v43 = vshll.u32 %v256_v32, 16  ;;  %v259_v13 = vshrl.u32 %v255_v29, 16  ;;  %v281_v53 = vshrl.u32 %v277_v23, 16  ;;  %v261_v57 = vshrl.u32 %v256_v32, 16 }
  0x3c   :  { %v626_v46 = vshrl.u32 %v145_v36, 30  ;;  %vm262_vm15 = vc.u32 %v254_v28, %v258_v31  ;;  %v264_v37 = vadd.s32 %v258_v31, %v254_v28  ;;  %vm284_vm0 = vc.u32 %v276_v30, %v280_v34 }
  0x3d   :  { %v263_v48 = vsel %vm262_vm15, 1, %v478_v45  ;;  %v285_v42 = vsel %vm284_vm0, 1, %v478_v45  ;;  %v286_v50 = vadd.s32 %v280_v34, %v276_v30  ;;  %v283_v25 = vshrl.u32 %v278_v20, 16 }
  0x3e   :  { %v147_v51 = vshll.u32 %v626_v46, 30  ;;  %v265_v52 = vadd.s32 %v263_v48, %v257_v40  ;;  %vm266_vm1 = vc.u32 %v264_v37, %v260_v43  ;;  %v287_v54 = vadd.s32 %v285_v42, %v279_v27 }
  0x3f   :  { %v267_v33 = vsel %vm266_vm1, 1, %v478_v45  ;;  %vm288_vm2 = vc.u32 %v286_v50, %v282_v49  ;;  %v290_v44 = vadd.s32 %v286_v50, %v282_v49  ;;  %v240_v62 = vsel %vm234_vm12, %v237_v41, %v239_v47 }
  0x40   :  { %v148_v56 = vsub.s32 %v144_v26, %v147_v51  ;;  %v269_v59 = vadd.s32 %v267_v33, %v265_v52  ;;  %v289_v14 = vsel %vm288_vm2, 1, %v478_v45  ;;  %v294_v7 = vmul.u32 %v523_v38, %v240_v62 }
  0x41   :  { %v291_v35 = vadd.s32 %v289_v14, %v287_v54  ;;  %v140_v45 = vadd.s32 %v585_v58, %v599_v63  ;;  %v170_v32 = vsub.s32 4, %v626_v46  ;;  %vm48_vm7 = vcmp.lt.s32.totalorder %v501_v4, 0 }
  0x42   :  { %vm149_vm3 = vcmp.lt.s32.totalorder %v148_v56, 0  ;;  %v150_v60 = vsub.s32 0, %v148_v56  ;;  %v270_v61 = vadd.s32 %v269_v59, %v259_v13  ;;  %vm648_vm8 = vcmp.le.f32.partialorder %v46_v6, 0.7853982 }
  0x43   :  { %v292_v1 = vadd.s32 %v291_v35, %v281_v53  ;;  %v171_v41 = vsel %vm48_vm7, %v170_v32, %v626_v46  ;;  %vm203_vm11 = vcmp.lt.s32.totalorder %v503_v5, 0  ;;  %vm662_vm13 = vcmp.le.f32.partialorder %v201_v8, 0.7853982 }
  0x44   :  { %v151_v2 = vsel %vm149_vm3, %v150_v60, %v148_v56  ;;  %v271_v24 = vadd.s32 %v270_v61, %v261_v57  ;;  %v173_v47 = vsel %vm648_vm8, 0, %v171_v41  ;;  %vm189_vm15 = vweird.f32 %v501_v4 }
  0x45   :  { %v152_v0 = vclz %v151_v2  ;;  %v293_v3 = vadd.s32 %v292_v1, %v283_v25  ;;  %v190_v53 = vadd.s32 3, %v173_v47  ;;  %vm344_vm3 = vweird.f32 %v503_v5 }
  0x46   :  { %vm296_vm4 = vc.u32 %v271_v24, %v290_v44  ;;  %v295_v37 = vadd.s32 %v290_v44, %v271_v24 }
  0x47   :  { %v377_v9 = vadd.s32 4294967294, %v152_v0  ;;  %v297_v10 = vadd.s32 1, %v293_v3  ;;  %v191_v60 = vand.u32 3, %v190_v53 }
  0x49   :  { %vm378_vm5 = vcmp.lt.s32.totalorder %v377_v9, 0  ;;  %v298_v11 = vsel %vm296_vm4, %v297_v10, %v293_v3  ;;  %vm196_vm10 = vcmp.eq.s32.totalorder %v191_v60, 2  ;;  %vm193_vm12 = vcmp.eq.s32.totalorder %v191_v60, 0 }
  0x4a   :  { %v155_v12 = vsel %vm378_vm5, 0, %v377_v9  ;;  %v299_v15 = vadd.s32 %v298_v11, %v294_v7  ;;  %vm192_vm14 = vcmp.lt.s32.totalorder %v191_v60, 2 }
  0x4b   :  { %v156_v16 = vsub.s32 32, %v155_v12  ;;  %v157_v55 = vshll.u32 %v148_v56, %v155_v12  ;;  %v160_v17 = vsub.s32 4294967266, %v155_v12 }
  0x4c   :  { %v300_v18 = vadd.s32 536870912, %v299_v15 }
  0x4d   :  { %v158_v19 = vshrl.u32 %v140_v45, %v156_v16  ;;  %v161_v21 = vadd.s32 127, %v160_v17 }
  0x4e   :  { %v641_v22 = vshrl.u32 %v300_v18, 30 }
  0x4f   :  { %v159_v23 = vor.u32 %v158_v19, %v157_v55  ;;  %v162_v38 = vshll.u32 %v161_v21, 23 }
  0x50   :  { %v302_v20 = vshll.u32 %v641_v22, 30  ;;  %v325_v10 = vsub.s32 4, %v641_v22 }
  0x51   :  { %v163_v26 = vor.u32 4788187, %v162_v38  ;;  %v166_v28 = vcvt.s32.f32 %v159_v23 }
  0x52   :  { %v303_v29 = vsub.s32 %v299_v15, %v302_v20  ;;  %v326_v17 = vsel %vm203_vm11, %v325_v10, %v641_v22 }
  0x53   :  { %v164_v58 = vand.u32 2147483647, %v163_v26  ;;  %v328_v23 = vsel %vm662_vm13, 0, %v326_v17 }
  0x54   :  { %vm304_vm6 = vcmp.lt.s32.totalorder %v303_v29, 0  ;;  %v305_v63 = vsub.s32 0, %v303_v29 }
  0x55   :  { %v167_v30 = vmul.f32 %v166_v28, %v164_v58 }
  0x56   :  { %v306_v34 = vsel %vm304_vm6, %v305_v63, %v303_v29 }
  0x57   :  { %v168_v39 = vxor.u32 2147483648, %v167_v30  ;;  %v307_v40 = vclz %v306_v34 }
  0x59   :  { %v169_v31 = vsel %vm48_vm7, %v168_v39, %v167_v30  ;;  %v380_v43 = vadd.s32 4294967294, %v307_v40 }
  0x5a   :  { %v172_v27 = vsel %vm648_vm8, %v501_v4, %v169_v31  ;;  %v345_v4 = vadd.s32 3, %v328_v23 }
  0x5b   :  { %v174_v49 = vmul.f32 %v172_v27, %v172_v27  ;;  %vm381_vm9 = vcmp.lt.s32.totalorder %v380_v43, 0 }
  0x5c   :  { %v310_v6 = vsel %vm381_vm9, 0, %v380_v43  ;;  %v346_v30 = vand.u32 3, %v345_v4 }
  0x5d   :  { %v175_v48 = vmul.f32 -0.001358992, %v174_v49  ;;  %v182_v42 = vmul.f32 -0.00019511016, %v174_v49  ;;  %v311_v50 = vsub.s32 32, %v310_v6  ;;  %v312_v51 = vshll.u32 %v303_v29, %v310_v6 }
  0x5e   :  { %v315_v13 = vsub.s32 4294967266, %v310_v6  ;;  %vm351_vm0 = vcmp.eq.s32.totalorder %v346_v30, 2  ;;  %vm348_vm1 = vcmp.eq.s32.totalorder %v346_v30, 0  ;;  %vm347_vm2 = vcmp.lt.s32.totalorder %v346_v30, 2 }
  0x5f   :  { %v176_v52 = vadd.f32 0.041655596, %v175_v48  ;;  %v183_v33 = vadd.f32 0.008332121, %v182_v42  ;;  %v313_v46 = vshrl.u32 %v295_v37, %v311_v50 }
  0x60   :  { %v316_v54 = vadd.s32 127, %v315_v13 }
  0x61   :  { %v177_v56 = vmul.f32 %v176_v52, %v174_v49  ;;  %v184_v57 = vmul.f32 %v183_v33, %v174_v49  ;;  %v314_v59 = vor.u32 %v313_v46, %v312_v51 }
  0x62   :  { %v317_v14 = vshll.u32 %v316_v54, 23 }
  0x63   :  { %v178_v25 = vadd.f32 -0.4999988, %v177_v56  ;;  %v185_v35 = vadd.f32 -0.16666654, %v184_v57  ;;  %v321_v44 = vcvt.s32.f32 %v314_v59 }
  0x64   :  { %v318_v61 = vor.u32 4788187, %v317_v14 }
  0x65   :  { %v179_v62 = vmul.f32 %v178_v25, %v174_v49  ;;  %v186_v1 = vmul.f32 %v185_v35, %v174_v49 }
  0x66   :  { %v319_v2 = vand.u32 2147483647, %v318_v61 }
  0x67   :  { %v180_v24 = vadd.f32 1.0, %v179_v62  ;;  %v187_v0 = vadd.f32 1.0, %v186_v1 }
  0x68   :  { %v322_v3 = vmul.f32 %v321_v44, %v319_v2 }
  0x69   :  { %v188_v7 = vmul.f32 %v187_v0, %v172_v27  ;;  %v197_v9 = vxor.u32 2147483648, %v180_v24 }
  0x6a   :  { %v323_v11 = vxor.u32 2147483648, %v322_v3 }
  0x6b   :  { %v194_v12 = vxor.u32 2147483648, %v188_v7  ;;  %v198_v15 = vsel %vm196_vm10, %v197_v9, %v188_v7 }
  0x6c   :  { %v324_v16 = vsel %vm203_vm11, %v323_v11, %v322_v3 }
  0x6d   :  { %v195_v55 = vsel %vm193_vm12, %v180_v24, %v194_v12  ;;  %v327_v18 = vsel %vm662_vm13, %v503_v5, %v324_v16 }
  0x6e   :  { %v199_v19 = vsel %vm192_vm14, %v195_v55, %v198_v15  ;;  %v329_v21 = vmul.f32 %v327_v18, %v327_v18 }
  0x6f   :  { %v200_v8 = vsel %vm189_vm15, nan, %v199_v19 }
  0x70   :  { %v330_v38 = vmul.f32 -0.001358992, %v329_v21  ;;  %v337_v20 = vmul.f32 -0.00019511016, %v329_v21  ;;  %356 = vst [vmem:[#allocation7] sm:$0xff] %v200_v8 }
  0x72   :  { %v331_v26 = vadd.f32 0.041655596, %v330_v38  ;;  %v338_v28 = vadd.f32 0.008332121, %v337_v20 }
  0x74   :  { %v332_v29 = vmul.f32 %v331_v26, %v329_v21  ;;  %v339_v58 = vmul.f32 %v338_v28, %v329_v21 }
  0x76   :  { %v333_v63 = vadd.f32 -0.4999988, %v332_v29  ;;  %v340_v22 = vadd.f32 -0.16666654, %v339_v58 }
  0x78   :  { %v334_v32 = vmul.f32 %v333_v63, %v329_v21  ;;  %v341_v34 = vmul.f32 %v340_v22, %v329_v21 }
  0x7a   :  { %v335_v36 = vadd.f32 1.0, %v334_v32  ;;  %v342_v39 = vadd.f32 1.0, %v341_v34 }
  0x7c   :  { %v343_v40 = vmul.f32 %v342_v39, %v327_v18  ;;  %v352_v31 = vxor.u32 2147483648, %v335_v36 }
  0x7e   :  { %v349_v41 = vxor.u32 2147483648, %v343_v40  ;;  %v353_v43 = vsel %vm351_vm0, %v352_v31, %v343_v40 }
  0x80   :  { %v350_v27 = vsel %vm348_vm1, %v335_v36, %v349_v41 }
  0x81   :  { %v354_v49 = vsel %vm347_vm2, %v350_v27, %v353_v43 }
  0x82   :  { %v355_v37 = vsel %vm344_vm3, nan, %v354_v49 }
  0x83   :  { %357 = vst [vmem:[#allocation7 + $0x8] sm:$0xff] %v355_v37 }
  0x84   :  { %368 = dma.vmem_to_hbm [thread:$0]  %s364_s1, 256, %s366_s21, [#allocation4]  }
  0x85   :  { %468 = dma.done.wait [#allocation4], 256  }
  0x86   :  { %469 = vsyncadd [#allocation4], 4294967040 }
  0x87   :  { %373 = vsyncpa [#allocation3], 1 }
  0x88   :  { %374 = vsyncpa [#allocation6], 1 }
  0x89   :  { %375 = vsyncpa [#allocation4], 1 }

</bundles_post_ra>
